<compile_context>
chip_gen: v6e
topology: v6e:2x2x1
jax: 0.10.0
libtpu: 0.0.40
codegen_flags: <defaults>
</compile_context>

<pallas_src>
import functools

import jax
import jax.numpy as jnp
from jax.experimental import pallas as pl
from jax.experimental.pallas import tpu as pltpu


# ---------------------------------------------------------------------------
# Single-pass kernel: whole spatial extent resident per block.
# ---------------------------------------------------------------------------
def _channel_gate_kernel(x_ref, w1_ref, b1_ref, w2_ref, b2_ref, o_ref):
    # x_ref / o_ref: (TN, C, HW).  Weight blocks are constant across the grid
    # (index_map always (0, 0)) so they stay resident in VMEM.
    x = x_ref[...]                                   # input dtype, (TN, C, HW)
    tn = x_ref.shape[0]
    hw = x_ref.shape[-1]

    # Pools over the spatial (lane) axis; only the tiny (TN, C) results are f32.
    avg = jnp.sum(x, axis=-1, dtype=jnp.float32) * (1.0 / hw)    # (TN, C)
    mx = jnp.max(x, axis=-1).astype(jnp.float32)                 # (TN, C)

    # Fused MLP: stack [avg; max] so each Linear runs ONCE per block.
    p = jnp.concatenate([avg, mx], axis=0)                       # (2*TN, C)
    h = jnp.dot(p, w1_ref[...], preferred_element_type=jnp.float32) + b1_ref[...]
    h = jnp.maximum(h, 0.0)
    a = jnp.dot(h, w2_ref[...], preferred_element_type=jnp.float32) + b2_ref[...]
    scale = jax.nn.sigmoid(a[:tn, :] + a[tn:, :])                # (TN, C)

    # Re-read the block from VMEM for the multiply/store: VMEM re-load is
    # essentially free and keeps the block's loads from staying live across
    # the serial pool->MLP->sigmoid chain once blocks are several MiB.
    o_ref[...] = x_ref[...] * scale[:, :, None].astype(o_ref.dtype)


# ---------------------------------------------------------------------------
# HW-tiled fallback, pass 1: accumulate pools over HW tiles, emit scale.
# ---------------------------------------------------------------------------
def _pool_scale_kernel(x_ref, w1_ref, b1_ref, w2_ref, b2_ref, scale_ref,
                       sum_sc, max_sc, *, hw_true, hw_tile):
    hw_i = pl.program_id(1)

    @pl.when(hw_i == 0)
    def _():
        sum_sc[...] = jnp.zeros_like(sum_sc)
        max_sc[...] = jnp.full_like(max_sc, -jnp.inf)

    x = x_ref[...]                                   # (1, C, hw_tile)
    if hw_true % hw_tile != 0:
        # Ragged last tile: mask lanes past the true spatial extent.
        lane = jax.lax.broadcasted_iota(jnp.int32, x.shape, dimension=2)
        valid = (hw_i * hw_tile + lane) < hw_true
        x_sum = jnp.where(valid, x, jnp.zeros((), x.dtype))
        x_max = jnp.where(valid, x, jnp.full((), -jnp.inf, x.dtype))
    else:
        x_sum = x
        x_max = x
    sum_sc[...] += jnp.sum(x_sum, axis=-1, dtype=jnp.float32)
    max_sc[...] = jnp.maximum(max_sc[...],
                              jnp.max(x_max, axis=-1).astype(jnp.float32))

    @pl.when(hw_i == pl.num_programs(1) - 1)
    def _():
        avg = sum_sc[...] * (1.0 / hw_true)                      # (1, C)
        p = jnp.concatenate([avg, max_sc[...]], axis=0)          # (2, C)
        h = jnp.dot(p, w1_ref[...], preferred_element_type=jnp.float32) + b1_ref[...]
        h = jnp.maximum(h, 0.0)
        a = jnp.dot(h, w2_ref[...], preferred_element_type=jnp.float32) + b2_ref[...]
        s = jax.nn.sigmoid(a[:1, :] + a[1:, :])                  # (1, C)
        scale_ref[...] = s[:, :, None].astype(scale_ref.dtype)   # (1, C, 1)


# ---------------------------------------------------------------------------
# HW-tiled fallback, pass 2: stream x * scale.
# ---------------------------------------------------------------------------
def _apply_scale_kernel(scale_ref, x_ref, o_ref):
    # scale_ref: (1, C, 1) broadcasts against the (1, C, hw_tile) block.
    o_ref[...] = x_ref[...] * scale_ref[...].astype(o_ref.dtype)


# ---------------------------------------------------------------------------
# Sizing helpers.
# ---------------------------------------------------------------------------
def _vmem_budget_bytes():
    """Physical VMEM per TensorCore minus headroom for Mosaic scratch/spill."""
    cap = 64 * 2**20  # conservative: v7x has the smallest VMEM (64 MiB / TC)
    try:
        cap = int(pltpu.get_tpu_info().vmem_capacity_bytes)
    except Exception:
        pass
    return max(32 * 2**20, cap - 16 * 2**20)   # 48 MiB on v7x, 112 MiB v5e/v6e


def _pick_batch_tile(n, bytes_per_row, target_bytes, min_split_bytes):
    """Largest divisor of n whose (TN, C, HW) block fits target_bytes."""
    best = 1
    for d in range(1, n + 1):
        if n % d == 0 and d * bytes_per_row <= target_bytes:
            best = d
    if best == n and n > 1:
        # Keep >=2 grid steps (so v7x's two TensorCores both get work on the
        # "parallel" axis) only when each resulting block stays big enough to
        # amortize per-step overhead; otherwise one big block wins -- on the
        # single-TensorCore v5e/v6e the grid is a serial loop anyway.
        for d in range(best - 1, 0, -1):
            if n % d == 0:
                if d * bytes_per_row >= min_split_bytes:
                    best = d
                break
    return best


# ---------------------------------------------------------------------------
# Wrapper.
# ---------------------------------------------------------------------------
def channel_gate(x_nchw, w1_t, b1, w2_t, b2, *,
                 target_block_bytes=None, force_hw_tiled=False):
    """x_nchw: (N, C, H, W); w1_t: (C, Cr); b1: (Cr,); w2_t: (Cr, C); b2: (C,)."""
    N, C, H, W = x_nchw.shape
    Cr = w1_t.shape[1]
    HW = H * W
    x = x_nchw.reshape(N, C, HW)

    itemsize = jnp.dtype(x_nchw.dtype).itemsize
    bytes_per_row = C * HW * itemsize
    weights_bytes = 4 * (C * Cr + Cr + Cr * C + C)

    vmem_budget = _vmem_budget_bytes()
    # Single-pass needs in+out blocks, double-buffered: 4*block (+ slack).
    max_block = (vmem_budget - 8 * 2**20) // 4
    if target_block_bytes is None:
        # ~8-10 MiB blocks on v7x, ~14 MiB on v5e/v6e.
        target_block_bytes = max(8 * 2**20, vmem_budget // 8)
    target = min(int(target_block_bytes), max_block)

    b1_2d = b1.reshape(1, Cr)
    b2_2d = b2.reshape(1, C)

    if force_hw_tiled or bytes_per_row > max_block:
        # ---- Two-pass, HW-tiled fallback (huge feature maps, esp. v7x). ----
        hw_tile = max(128, (max(target, 128 * C * itemsize)
                            // (C * itemsize)) // 128 * 128)
        hw_tile = min(hw_tile, ((HW + 127) // 128) * 128)
        n_hw = pl.cdiv(HW, hw_tile)
        tile_bytes = C * hw_tile * itemsize

        pool_vmem = int(min(vmem_budget,
                            max(32 * 2**20, 4 * tile_bytes + weights_bytes + 8 * 2**20)))
        scale = pl.pallas_call(
            functools.partial(_pool_scale_kernel, hw_true=HW, hw_tile=hw_tile),
            out_shape=jax.ShapeDtypeStruct((N, C, 1), jnp.float32),
            grid_spec=pltpu.PrefetchScalarGridSpec(
                num_scalar_prefetch=0,
                grid=(N, n_hw),
                in_specs=[
                    pl.BlockSpec((1, C, hw_tile), lambda n, h: (n, 0, h)),  # x tile
                    pl.BlockSpec((C, Cr), lambda n, h: (0, 0)),             # W1^T
                    pl.BlockSpec((1, Cr), lambda n, h: (0, 0)),             # b1
                    pl.BlockSpec((Cr, C), lambda n, h: (0, 0)),             # W2^T
                    pl.BlockSpec((1, C), lambda n, h: (0, 0)),              # b2
                ],
                out_specs=pl.BlockSpec((1, C, 1), lambda n, h: (n, 0, 0)),
                scratch_shapes=[pltpu.VMEM((1, C), jnp.float32),   # running sum
                                pltpu.VMEM((1, C), jnp.float32)],  # running max
            ),
            compiler_params=pltpu.CompilerParams(
                dimension_semantics=("parallel", "arbitrary"),
                vmem_limit_bytes=pool_vmem,
            ),
        )(x, w1_t, b1_2d, w2_t, b2_2d)

        apply_vmem = int(min(vmem_budget,
                             max(32 * 2**20, 4 * tile_bytes + 8 * 2**20)))
        out = pl.pallas_call(
            _apply_scale_kernel,
            out_shape=jax.ShapeDtypeStruct((N, C, HW), x_nchw.dtype),
            grid_spec=pltpu.PrefetchScalarGridSpec(
                num_scalar_prefetch=0,
                grid=(N, n_hw),
                in_specs=[
                    pl.BlockSpec((1, C, 1), lambda n, h: (n, 0, 0)),         # scale
                    pl.BlockSpec((1, C, hw_tile), lambda n, h: (n, 0, h)),   # x tile
                ],
                out_specs=pl.BlockSpec((1, C, hw_tile), lambda n, h: (n, 0, h)),
            ),
            compiler_params=pltpu.CompilerParams(
                dimension_semantics=("parallel", "parallel"),
                vmem_limit_bytes=apply_vmem,
            ),
        )(scale, x)
        return out.reshape(N, C, H, W)

    # ---- Single-pass path. ----
    per_block_target = max(target, bytes_per_row)
    TN = _pick_batch_tile(N, bytes_per_row, per_block_target,
                          min_split_bytes=2 * 2**20)
    grid = (N // TN,)
    block_bytes = TN * bytes_per_row
    vmem_limit = int(min(vmem_budget,
                         max(32 * 2**20, 4 * block_bytes + weights_bytes + 8 * 2**20)))

    out = pl.pallas_call(
        _channel_gate_kernel,
        out_shape=jax.ShapeDtypeStruct((N, C, HW), x_nchw.dtype),
        grid_spec=pltpu.PrefetchScalarGridSpec(
            num_scalar_prefetch=0,
            grid=grid,
            in_specs=[
                pl.BlockSpec((TN, C, HW), lambda n: (n, 0, 0)),   # x block
                pl.BlockSpec((C, Cr), lambda n: (0, 0)),          # W1^T (resident)
                pl.BlockSpec((1, Cr), lambda n: (0, 0)),          # b1
                pl.BlockSpec((Cr, C), lambda n: (0, 0)),          # W2^T
                pl.BlockSpec((1, C), lambda n: (0, 0)),           # b2
            ],
            out_specs=pl.BlockSpec((TN, C, HW), lambda n: (n, 0, 0)),
        ),
        compiler_params=pltpu.CompilerParams(
            dimension_semantics=("parallel",),
            vmem_limit_bytes=vmem_limit,
        ),
    )(x, w1_t, b1_2d, w2_t, b2_2d)
    return out.reshape(N, C, H, W)


def reference_channel_gate(x_nchw, w1_t, b1, w2_t, b2):
    xf = x_nchw.astype(jnp.float32)
    avg = xf.mean(axis=(2, 3))       # (N, C)
    mx = xf.max(axis=(2, 3))         # (N, C)

    def mlp(p):
        h = jnp.maximum(p @ w1_t + b1, 0.0)
        return h @ w2_t + b2

    scale = jax.nn.sigmoid(mlp(avg) + mlp(mx))[:, :, None, None]
    return (xf * scale).astype(x_nchw.dtype)


if __name__ == "__main__":
    def make_params(key, C, Cr):
        # PyTorch Linear-style uniform init, stored pre-transposed (fan_in, fan_out).
        k1, k2, k3, k4 = jax.random.split(key, 4)
        bound1 = 1.0 / jnp.sqrt(C)
        bound2 = 1.0 / jnp.sqrt(Cr)
        w1_t = jax.random.uniform(k1, (C, Cr), jnp.float32, -bound1, bound1)
        b1 = jax.random.uniform(k2, (Cr,), jnp.float32, -bound1, bound1)
        w2_t = jax.random.uniform(k3, (Cr, C), jnp.float32, -bound2, bound2)
        b2 = jax.random.uniform(k4, (C,), jnp.float32, -bound2, bound2)
        return w1_t, b1, w2_t, b2

    key = jax.random.PRNGKey(0)
    kx1, kp1, kx2, kp2 = jax.random.split(key, 4)

    # Case 1: ChannelGate(gate_channels=64, reduction_ratio=16), single-pass path.
    N, C, H, W = 2, 64, 16, 16
    Cr = C // 16
    x1 = jax.random.normal(kx1, (N, C, H, W), dtype=jnp.float32)
    p1 = make_params(kp1, C, Cr)
    ref1 = reference_channel_gate(x1, *p1)

    out1 = jax.block_until_ready(channel_gate(x1, *p1))
    assert out1.shape == x1.shape
    assert jnp.allclose(out1, ref1, atol=1e-5, rtol=1e-5), "single-pass mismatch"

    # Case 2: same inputs forced through the HW-tiled two-pass fallback
    # (exercises the pool-accumulation grid used for huge feature maps on v7x).
    out2 = jax.block_until_ready(
        channel_gate(x1, *p1, target_block_bytes=32 * 1024, force_hw_tiled=True))
    assert jnp.allclose(out2, ref1, atol=1e-5, rtol=1e-5), "hw-tiled mismatch"

    # Case 3: spatial size not a multiple of 128 (13x13=169): single-pass and
    # ragged HW-tile + masking in the fallback.
    N, C, H, W = 2, 32, 13, 13
    Cr = C // 16
    x3 = jax.random.normal(kx2, (N, C, H, W), dtype=jnp.float32)
    p3 = make_params(kp2, C, Cr)
    ref3 = reference_channel_gate(x3, *p3)

    out3 = jax.block_until_ready(channel_gate(x3, *p3))
    assert jnp.allclose(out3, ref3, atol=1e-5, rtol=1e-5), "ragged single-pass mismatch"

    out4 = jax.block_until_ready(
        channel_gate(x3, *p3, target_block_bytes=16 * 1024, force_hw_tiled=True))
    assert jnp.allclose(out4, ref3, atol=1e-5, rtol=1e-5), "ragged hw-tiled mismatch"

    print("KERNEL_OK")
</pallas_src>

<mosaic_0001>
module attributes {stable_mosaic.version = 11 : i64} {
  func.func @_channel_gate_kernel(%arg0: i32, %arg1: memref<2x64x256xf32, #tpu.memory_space<vmem>>, %arg2: memref<64x4xf32, #tpu.memory_space<vmem>>, %arg3: memref<1x4xf32, #tpu.memory_space<vmem>>, %arg4: memref<4x64xf32, #tpu.memory_space<vmem>>, %arg5: memref<1x64xf32, #tpu.memory_space<vmem>>, %arg6: memref<2x64x256xf32, #tpu.memory_space<vmem>>) attributes {dimension_semantics = [#tpu.dimension_semantics<parallel>], iteration_bounds = array<i64: 1>, scalar_prefetch = 0 : i64, scratch_operands = 0 : i64, tpu.core_type = #tpu.core_type<tc>, window_params = [{transform_indices = @transform_0, window_bounds = array<i64: 2, 64, 256>}, {pipeline_mode = #tpu.pipeline_mode<synchronous>, transform_indices = @transform_1, window_bounds = array<i64: 64, 4>}, {pipeline_mode = #tpu.pipeline_mode<synchronous>, transform_indices = @transform_2, window_bounds = array<i64: 1, 4>}, {pipeline_mode = #tpu.pipeline_mode<synchronous>, transform_indices = @transform_3, window_bounds = array<i64: 4, 64>}, {pipeline_mode = #tpu.pipeline_mode<synchronous>, transform_indices = @transform_4, window_bounds = array<i64: 1, 64>}, {transform_indices = @transform_5, window_bounds = array<i64: 2, 64, 256>}]} {
    %c0 = arith.constant 0 : index
    %c0_0 = arith.constant 0 : index
    %c0_1 = arith.constant 0 : index
    %0 = vector.load %arg1[%c0, %c0_0, %c0_1] : memref<2x64x256xf32, #tpu.memory_space<vmem>>, vector<2x64x256xf32>
    %cst = arith.constant dense<0.000000e+00> : vector<2x64xf32>
    %1 = vector.multi_reduction <add>, %0, %cst [2] : vector<2x64x256xf32> to vector<2x64xf32>
    %cst_2 = arith.constant 3.906250e-03 : f32
    %2 = vector.broadcast %cst_2 : f32 to vector<2x64xf32>
    %3 = arith.mulf %1, %2 : vector<2x64xf32>
    %cst_3 = arith.constant dense<0xFF800000> : vector<2x64xf32>
    %4 = vector.multi_reduction <maximumf>, %0, %cst_3 [2] : vector<2x64x256xf32> to vector<2x64xf32>
    %5 = tpu.concatenate %3, %4 in 0 : vector<2x64xf32>, vector<2x64xf32> -> vector<4x64xf32>
    %c0_4 = arith.constant 0 : index
    %c0_5 = arith.constant 0 : index
    %6 = vector.load %arg2[%c0_4, %c0_5] : memref<64x4xf32, #tpu.memory_space<vmem>>, vector<64x4xf32>
    %cst_6 = arith.constant dense<0.000000e+00> : vector<4x4xf32>
    %7 = tpu.matmul %5, %6, %cst_6 {dimension_numbers = #tpu.dot_dimension_numbers<[1], [0], [0], [1], [0, 0, 1, 1], [], []>} : vector<4x64xf32>, vector<64x4xf32>, vector<4x4xf32> -> vector<4x4xf32>
    %c0_7 = arith.constant 0 : index
    %c0_8 = arith.constant 0 : index
    %8 = vector.load %arg3[%c0_7, %c0_8] : memref<1x4xf32, #tpu.memory_space<vmem>>, vector<1x4xf32>
    %9 = vector.broadcast %8 : vector<1x4xf32> to vector<4x4xf32>
    %10 = arith.addf %7, %9 : vector<4x4xf32>
    %cst_9 = arith.constant 0.000000e+00 : f32
    %11 = vector.broadcast %cst_9 : f32 to vector<4x4xf32>
    %12 = arith.maximumf %10, %11 : vector<4x4xf32>
    %c0_10 = arith.constant 0 : index
    %c0_11 = arith.constant 0 : index
    %13 = vector.load %arg4[%c0_10, %c0_11] : memref<4x64xf32, #tpu.memory_space<vmem>>, vector<4x64xf32>
    %cst_12 = arith.constant dense<0.000000e+00> : vector<4x64xf32>
    %14 = tpu.matmul %12, %13, %cst_12 {dimension_numbers = #tpu.dot_dimension_numbers<[1], [0], [0], [1], [0, 0, 1, 1], [], []>} : vector<4x4xf32>, vector<4x64xf32>, vector<4x64xf32> -> vector<4x64xf32>
    %c0_13 = arith.constant 0 : index
    %c0_14 = arith.constant 0 : index
    %15 = vector.load %arg5[%c0_13, %c0_14] : memref<1x64xf32, #tpu.memory_space<vmem>>, vector<1x64xf32>
    %16 = vector.broadcast %15 : vector<1x64xf32> to vector<4x64xf32>
    %17 = arith.addf %14, %16 : vector<4x64xf32>
    %18 = vector.extract_strided_slice %17 {offsets = [0, 0], sizes = [2, 64], strides = [1, 1]} : vector<4x64xf32> to vector<2x64xf32>
    %19 = vector.extract_strided_slice %17 {offsets = [2, 0], sizes = [2, 64], strides = [1, 1]} : vector<4x64xf32> to vector<2x64xf32>
    %20 = arith.addf %18, %19 : vector<2x64xf32>
    %21 = arith.negf %20 : vector<2x64xf32>
    %22 = math.exp %21 : vector<2x64xf32>
    %cst_15 = arith.constant 1.000000e+00 : f32
    %23 = vector.broadcast %cst_15 : f32 to vector<2x64xf32>
    %24 = arith.addf %23, %22 : vector<2x64xf32>
    %25 = arith.divf %23, %24 : vector<2x64xf32>
    %c0_16 = arith.constant 0 : index
    %c0_17 = arith.constant 0 : index
    %c0_18 = arith.constant 0 : index
    %26 = vector.load %arg1[%c0_16, %c0_17, %c0_18] : memref<2x64x256xf32, #tpu.memory_space<vmem>>, vector<2x64x256xf32>
    %27 = vector.shape_cast %25 : vector<2x64xf32> to vector<2x64x1xf32>
    %28 = vector.broadcast %27 : vector<2x64x1xf32> to vector<2x64x256xf32>
    %29 = arith.mulf %26, %28 : vector<2x64x256xf32>
    %c0_19 = arith.constant 0 : index
    %c0_20 = arith.constant 0 : index
    %c0_21 = arith.constant 0 : index
    %30 = vector.load %arg6[%c0_19, %c0_20, %c0_21] : memref<2x64x256xf32, #tpu.memory_space<vmem>>, vector<2x64x256xf32>
    tpu.vector_store %arg6[%c0_19, %c0_20, %c0_21], %29 {strides = array<i32>} : memref<2x64x256xf32, #tpu.memory_space<vmem>>, vector<2x64x256xf32>,
    return
  }
  func.func @transform_0(%arg0: i32) -> (i32, i32, i32) {
    %c0_i32 = arith.constant 0 : i32
    %c0_i32_0 = arith.constant 0 : i32
    %c0_i32_1 = arith.constant 0 : i32
    return %arg0, %c0_i32, %c0_i32_0 : i32, i32, i32
  }
  func.func @transform_1(%arg0: i32) -> (i32, i32) {
    %c0_i32 = arith.constant 0 : i32
    %c0_i32_0 = arith.constant 0 : i32
    %c0_i32_1 = arith.constant 0 : i32
    return %c0_i32, %c0_i32_0 : i32, i32
  }
  func.func @transform_2(%arg0: i32) -> (i32, i32) {
    %c0_i32 = arith.constant 0 : i32
    %c0_i32_0 = arith.constant 0 : i32
    %c0_i32_1 = arith.constant 0 : i32
    return %c0_i32, %c0_i32_0 : i32, i32
  }
  func.func @transform_3(%arg0: i32) -> (i32, i32) {
    %c0_i32 = arith.constant 0 : i32
    %c0_i32_0 = arith.constant 0 : i32
    %c0_i32_1 = arith.constant 0 : i32
    return %c0_i32, %c0_i32_0 : i32, i32
  }
  func.func @transform_4(%arg0: i32) -> (i32, i32) {
    %c0_i32 = arith.constant 0 : i32
    %c0_i32_0 = arith.constant 0 : i32
    %c0_i32_1 = arith.constant 0 : i32
    return %c0_i32, %c0_i32_0 : i32, i32
  }
  func.func @transform_5(%arg0: i32) -> (i32, i32, i32) {
    %c0_i32 = arith.constant 0 : i32
    %c0_i32_0 = arith.constant 0 : i32
    %c0_i32_1 = arith.constant 0 : i32
    return %arg0, %c0_i32, %c0_i32_0 : i32, i32, i32
  }
}

</mosaic_0001>

<bundles_post_ra>
// kernel: tpu_custom_call.1
= control target key start
LH: loop header
LB: loop body
LE: loop exit
PB: predicated region body
PF: predicated region fallthrough
CT: control target
= control target key end

     0   :  { %10 = vsyncpa [#allocation3], 0  ;;  %s1184_s0 = inlined_call_operand.hbm [shape: f32[2,64,256], index: 0, kind: input, shape index: {}]   ;;  %s1185_s1 = inlined_call_operand.vmem [shape: f32[64,4], index: 1, kind: input, shape index: {}]   ;;  %s1186_s2 = inlined_call_operand.vmem [shape: f32[1,4], index: 2, kind: input, shape index: {}]   ;;  %s1187_s3 = inlined_call_operand.vmem [shape: f32[4,64], index: 3, kind: input, shape index: {}]   ;;  %s1188_s4 = inlined_call_operand.vmem [shape: f32[1,64], index: 4, kind: input, shape index: {}]   ;;  %s1189_s5 = inlined_call_operand.hbm [shape: f32[2,64,256], index: 5, kind: output, shape index: {}]  }
   0x1   :  { %11 = vsyncpa [#allocation4], 0  ;;  %s823_s18 = smov [#allocation2]  }
   0x2   :  { %s17_s19 = sshll.u32 %s823_s18, 4  ;;  %s18_s19 = int_to_ptr.vmem [resolvable:$true] %s17_s19 }
   0x3   :  { %s787_s20 = scalar_lea.vmem %s18_s19, 4096  ;;  %p792_p1 = scmp.lt.s32.totalorder %s18_s19, %s18_s19 }
   0x4   :  { %p788_p0 = scmp.ne.s32.totalorder %s18_s19, %s787_s20  ;;  %p793_p2 = scmp.lt.s32.totalorder %s787_s20, %s787_s20 }
   0x6   :  { %p794_p3 = por %p793_p2, %p792_p1 }
   0x8   :  { %p795_p4 = pnand %p794_p3, %p788_p0 }
   0xa   :  { %798 = shalt.err (!%p795_p4)
}
   0xb   :  { %s824_s21 = smov 256   ;;  %s825_s22 = smov 16  }
   0xc   :  { %23 = dma.hbm_to_vmem [thread:$0]  %s1184_s0, 4096, %s18_s19, [#allocation3], %s824_s21, %s824_s21, %s825_s22  }
   0xd   :  { %819 = dma.done.wait [#allocation3], 4096  }
   0xe   :  { %820 = vsyncadd [#allocation3], 4294963200  ;;  %v865_v0 = vld [vmem:[#allocation2 + $0x80] sm:$0xff]  ;;  %v867_v1 = vld [vmem:[#allocation2 + $0x88] sm:$0xff]  ;;  %vm827_vm0 = vmmov 0   ;;  %vm206_vm1 = vcmask 130112  }
   0xf   :  { %v869_v2 = vld [vmem:[#allocation2] sm:$0xff]  ;;  %v91_v3 = vadd.f32 %v867_v1, %v865_v0  ;;  %v873_v4 = vld [vmem:[#allocation2 + $0x8] sm:$0xff]  ;;  %v875_v5 = vld [vmem:[#allocation2 + $0x90] sm:$0xff]  ;;  %v155_v27 = vmax.f32 %v865_v0, %v867_v1  ;;  %vm213_vm2 = vcmask 195712   ;;  %vm220_vm3 = vcmask 261312  }
  0x10   :  { %1203 = vst [vmem:[#allocation8_spill] sm:$0xff] %v875_v5  ;;  %v877_v6 = vld [vmem:[#allocation2 + $0x98] sm:$0xff]  ;;  %v67_v7 = vadd.f32 %v873_v4, %v869_v2  ;;  %v881_v8 = vld [vmem:[#allocation2 + $0x10] sm:$0xff]  ;;  %v889_v12 = vld [vmem:[#allocation2 + $0xa0] sm:$0xff]  ;;  %v131_v25 = vmax.f32 %v869_v2, %v873_v4  ;;  %vm227_vm4 = vcmask 326912   ;;  %vm234_vm5 = vcmask 392512  }
  0x11   :  { %1204 = vst [vmem:[#allocation9_spill] sm:$0xff] %v877_v6  ;;  %v883_v9 = vld [vmem:[#allocation2 + $0x18] sm:$0xff]  ;;  %92 = vadd.xlane.f32.xlu1 %v91_v3  ;;  %v94_v10 = vadd.f32 %v877_v6, %v875_v5  ;;  %v891_v13 = vld [vmem:[#allocation2 + $0xa8] sm:$0xff]  ;;  %v893_v14 = vld [vmem:[#allocation2 + $0x20] sm:$0xff]  ;;  %v158_v26 = vmax.f32 %v875_v5, %v877_v6  ;;  %v826_v3 = vmov 0.0   ;;  %vm241_vm6 = vcmask 458112  }
  0x12   :  { %68 = vadd.xlane.f32.xlu0 %v67_v7  ;;  %v70_v11 = vadd.f32 %v883_v9, %v881_v8  ;;  %1205 = vst [vmem:[#allocation10_spill] sm:$0xff] %v891_v13  ;;  %v895_v15 = vld [vmem:[#allocation2 + $0x28] sm:$0xff]  ;;  %v97_v16 = vadd.f32 %v891_v13, %v889_v12  ;;  %v901_v18 = vld [vmem:[#allocation2 + $0xb0] sm:$0xff]  ;;  %v903_v19 = vld [vmem:[#allocation2 + $0xb8] sm:$0xff]  ;;  %v134_v24 = vmax.f32 %v881_v8, %v883_v9  ;;  %vm248_vm7 = vcmask 523712  }
  0x13   :  { %v73_v17 = vadd.f32 %v895_v15, %v893_v14  ;;  %1206 = vst [vmem:[#allocation11_spill] sm:$0xff] %v901_v18  ;;  %1207 = vst [vmem:[#allocation12_spill] sm:$0xff] %v903_v19  ;;  %v905_v20 = vld [vmem:[#allocation2 + $0x30] sm:$0xff]  ;;  %v907_v21 = vld [vmem:[#allocation2 + $0x38] sm:$0xff]  ;;  %v100_v22 = vadd.f32 %v903_v19, %v901_v18  ;;  %v161_v34 = vmax.f32 %v889_v12, %v891_v13  ;;  %745 = vmatprep.subr.mxu0 %v826_v3  ;;  %vm289_vm8 = vcmask 1041409  }
  0x14   :  { %v76_v23 = vadd.f32 %v907_v21, %v905_v20  ;;  %v921_v28 = vld [vmem:[#allocation2 + $0xc0] sm:$0xff]  ;;  %v923_v29 = vld [vmem:[#allocation2 + $0xc8] sm:$0xff]  ;;  %v137_v35 = vmax.f32 %v893_v14, %v895_v15  ;;  %v937_v36 = vld [vmem:[#allocation2 + $0xd0] sm:$0xff]  ;;  %v164_v42 = vmax.f32 %v901_v18, %v903_v19  ;;  %v140_v43 = vmax.f32 %v905_v20, %v907_v21  ;;  %764 = vmatprep.subr.mxu1 %v826_v3 }
  0x15   :  { %95 = vadd.xlane.f32.xlu1 %v94_v10  ;;  %1208 = vst [vmem:[#allocation13_spill] sm:$0xff] %v921_v28  ;;  %1209 = vst [vmem:[#allocation14_spill] sm:$0xff] %v923_v29  ;;  %v925_v30 = vld [vmem:[#allocation2 + $0x40] sm:$0xff]  ;;  %v927_v31 = vld [vmem:[#allocation2 + $0x48] sm:$0xff]  ;;  %v103_v32 = vadd.f32 %v923_v29, %v921_v28  ;;  %v167_v50 = vmax.f32 %v921_v28, %v923_v29  ;;  %761 = vmatprep.mubr.msk.f32.mxu0 %vm827_vm0, %v826_v3  ;;  %vm386_vm9 = vcmask 1043459   ;;  %vm389_vm10 = vcmask 1041408  }
  0x16   :  { %71 = vadd.xlane.f32.xlu0 %v70_v11  ;;  %v79_v33 = vadd.f32 %v927_v31, %v925_v30  ;;  %1210 = vst [vmem:[#allocation15_spill] sm:$0xff] %v937_v36  ;;  %v939_v37 = vld [vmem:[#allocation2 + $0xd8] sm:$0xff]  ;;  %v941_v38 = vld [vmem:[#allocation2 + $0x50] sm:$0xff]  ;;  %v953_v44 = vld [vmem:[#allocation2 + $0xe0] sm:$0xff]  ;;  %v143_v51 = vmax.f32 %v925_v30, %v927_v31  ;;  %766 = vmatprep.mubr.msk.f32.mxu1 %vm827_vm0, %v826_v3  ;;  %vm406_vm11 = vcmask 523264   ;;  %vm493_vm12 = vcmask 1043456  }
  0x17   :  { %1211 = vst [vmem:[#allocation16_spill] sm:$0xff] %v939_v37  ;;  %v943_v39 = vld [vmem:[#allocation2 + $0x58] sm:$0xff]  ;;  %v106_v40 = vadd.f32 %v939_v37, %v937_v36  ;;  %1212 = vst [vmem:[#allocation17_spill] sm:$0xff] %v953_v44  ;;  %v955_v45 = vld [vmem:[#allocation2 + $0xe8] sm:$0xff]  ;;  %v170_v58 = vmax.f32 %v937_v36, %v939_v37  ;;  %vm489_vm13 = vcmask 31744  }
  0x18   :  { %v82_v41 = vadd.f32 %v943_v39, %v941_v38  ;;  %1213 = vst [vmem:[#allocation18_spill] sm:$0xff] %v955_v45  ;;  %v957_v46 = vld [vmem:[#allocation2 + $0x60] sm:$0xff]  ;;  %v959_v47 = vld [vmem:[#allocation2 + $0x68] sm:$0xff]  ;;  %v109_v48 = vadd.f32 %v955_v45, %v953_v44  ;;  %v969_v52 = vld [vmem:[#allocation2 + $0xf0] sm:$0xff]  ;;  %v146_v59 = vmax.f32 %v941_v38, %v943_v39  ;;  %v173_v60 = vmax.f32 %v953_v44, %v955_v45 }
  0x19   :  { %98 = vadd.xlane.f32.xlu1 %v97_v16  ;;  %v85_v49 = vadd.f32 %v959_v47, %v957_v46  ;;  %1214 = vst [vmem:[#allocation19_spill] sm:$0xff] %v969_v52  ;;  %v971_v53 = vld [vmem:[#allocation2 + $0xf8] sm:$0xff]  ;;  %v973_v54 = vld [vmem:[#allocation2 + $0x70] sm:$0xff]  ;;  %v149_v61 = vmax.f32 %v957_v46, %v959_v47  ;;  %v396_v11 = vld [vmem:[%s1185_s1 + $0x28] sm:$0xff] }
  0x1a   :  { %74 = vadd.xlane.f32.xlu0 %v73_v17  ;;  %1215 = vst [vmem:[#allocation20_spill] sm:$0xff] %v971_v53  ;;  %v975_v55 = vld [vmem:[#allocation2 + $0x78] sm:$0xff]  ;;  %v112_v56 = vadd.f32 %v971_v53, %v969_v52  ;;  %v176_v62 = vmax.f32 %v969_v52, %v971_v53  ;;  %v397_v10 = vld [vmem:[%s1185_s1 + $0x30] sm:$0xff]  ;;  %v395_v16 = vld [vmem:[%s1185_s1 + $0x20] sm:$0xff] }
  0x1b   :  { %v88_v57 = vadd.f32 %v975_v55, %v973_v54  ;;  %v152_v63 = vmax.f32 %v973_v54, %v975_v55  ;;  %v398_v7 = vld [vmem:[%s1185_s1 + $0x38] sm:$0xff] }
  0x1c   :  { %746 = vmatpush3.msra.mxu0 %v398_v7  ;;  %v394_v17 = vld [vmem:[%s1185_s1 + $0x18] sm:$0xff] }
  0x1d   :  { %101 = vadd.xlane.f32.xlu1 %v100_v22  ;;  %747 = vmatprep.subr.mxu0 %v826_v3  ;;  %v393_v22 = vld [vmem:[%s1185_s1 + $0x10] sm:$0xff] }
  0x1e   :  { %77 = vadd.xlane.f32.xlu0 %v76_v23  ;;  %748 = vmatpush3.msra.mxu0 %v397_v10  ;;  %v392_v23 = vld [vmem:[%s1185_s1 + $0x8] sm:$0xff] }
  0x1f   :  { %749 = vmatprep.subr.mxu0 %v826_v3 }
  0x20   :  { %750 = vmatpush3.msra.mxu0 %v396_v11 }
  0x21   :  { %135 = vmax.xlane.f32.xlu1 %v134_v24  ;;  %751 = vmatprep.subr.mxu0 %v826_v3  ;;  %v391_v24 = vld [vmem:[%s1185_s1] sm:$0xff] }
  0x22   :  { %132 = vmax.xlane.f32.xlu0 %v131_v25  ;;  %752 = vmatpush3.msra.mxu0 %v395_v16 }
  0x23   :  { %753 = vmatprep.subr.mxu0 %v826_v3 }
  0x24   :  { %754 = vmatpush3.msra.mxu0 %v394_v17 }
  0x25   :  { %159 = vmax.xlane.f32.xlu1 %v158_v26  ;;  %755 = vmatprep.subr.mxu0 %v826_v3 }
  0x26   :  { %156 = vmax.xlane.f32.xlu0 %v155_v27  ;;  %756 = vmatpush3.msra.mxu0 %v393_v22 }
  0x27   :  { %757 = vmatprep.subr.mxu0 %v826_v3 }
  0x28   :  { %758 = vmatpush3.msra.mxu0 %v392_v23 }
  0x29   :  { %104 = vadd.xlane.f32.xlu1 %v103_v32  ;;  %759 = vmatprep.subr.mxu0 %v826_v3 }
  0x2a   :  { %80 = vadd.xlane.f32.xlu0 %v79_v33  ;;  %760 = vmatpush3.msra.mxu0 %v391_v24 }
  0x2d   :  { %162 = vmax.xlane.f32.xlu1 %v161_v34 }
  0x2e   :  { %138 = vmax.xlane.f32.xlu0 %v137_v35 }
  0x31   :  { %107 = vadd.xlane.f32.xlu1 %v106_v40 }
  0x32   :  { %83 = vadd.xlane.f32.xlu0 %v82_v41 }
  0x35   :  { %165 = vmax.xlane.f32.xlu1 %v164_v42 }
  0x36   :  { %141 = vmax.xlane.f32.xlu0 %v140_v43 }
  0x39   :  { %110 = vadd.xlane.f32.xlu1 %v109_v48 }
  0x3a   :  { %86 = vadd.xlane.f32.xlu0 %v85_v49 }
  0x3d   :  { %168 = vmax.xlane.f32.xlu1 %v167_v50 }
  0x3e   :  { %144 = vmax.xlane.f32.xlu0 %v143_v51 }
  0x41   :  { %113 = vadd.xlane.f32.xlu1 %v112_v56 }
  0x42   :  { %89 = vadd.xlane.f32.xlu0 %v88_v57  ;;  %v195_v57 = vlaneseq }
  0x45   :  { %171 = vmax.xlane.f32.xlu1 %v170_v58 }
  0x46   :  { %147 = vmax.xlane.f32.xlu0 %v146_v59 }
  0x49   :  { %174 = vmax.xlane.f32.xlu1 %v173_v60  ;;  %v196_v60 = vand.u32 127, %v195_v57 }
  0x4a   :  { %150 = vmax.xlane.f32.xlu0 %v149_v61  ;;  %v1029_v61 = vshrl.u32 %v195_v57, 7 }
  0x4b   :  { %v208_v3 = vadd.s32 4294967280, %v196_v60  ;;  %v215_v10 = vadd.s32 4294967272, %v196_v60  ;;  %v222_v53 = vadd.s32 4294967264, %v196_v60  ;;  %v229_v52 = vadd.s32 4294967256, %v196_v60 }
  0x4c   :  { %v1036_v11 = vsub.s32 %v196_v60, %v1029_v61  ;;  %v236_v44 = vadd.s32 4294967248, %v196_v60 }
  0x4d   :  { %177 = vmax.xlane.f32.xlu1 %v176_v62  ;;  %v1042_v23 = vsub.s32 %v208_v3, %v1029_v61  ;;  %v1045_v45 = vsub.s32 %v215_v10, %v1029_v61 }
  0x4e   :  { %153 = vmax.xlane.f32.xlu0 %v152_v63  ;;  %v201_v63 = vadd.s32 4294967288, %v196_v60 }
  0x50   :  { %v1039_v17 = vsub.s32 %v201_v63, %v1029_v61 }
  0x9a   :  { %v93_v25 = vpop.xlane.xlu1 %92 }
  0x9b   :  { %v69_v26 = vpop.xlane.xlu0 %68  ;;  %v123_v37 = vmul.f32 0.00390625, %v93_v25 }
  0x9c   :  { %v115_v19 = vmul.f32 0.00390625, %v69_v26  ;;  %v1057_v26 = vsub.s32 %v229_v52, %v1029_v61 }
  0x9e   :  { %v96_v27 = vpop.xlane.xlu1 %95 }
  0x9f   :  { %v72_v32 = vpop.xlane.xlu0 %71  ;;  %v124_v22 = vmul.f32 0.00390625, %v96_v27  ;;  %v243_v27 = vadd.s32 4294967240, %v196_v60 }
  0xa0   :  { %v116_v57 = vmul.f32 0.00390625, %v72_v32 }
  0xa1   :  { %v257_v3 = vrot.slane %v124_v22, %v1039_v17  ;;  %v1062_v22 = vsub.s32 %v236_v44, %v1029_v61 }
  0xa2   :  { %v99_v33 = vpop.xlane.xlu1 %98  ;;  %v205_v25 = vrot.slane %v116_v57, %v1039_v17 }
  0xa3   :  { %v75_v34 = vpop.xlane.xlu0 %74  ;;  %v125_v36 = vmul.f32 0.00390625, %v99_v33  ;;  %v1054_v33 = vsub.s32 %v222_v53, %v1029_v61  ;;  %v1068_v53 = vsub.s32 %v243_v27, %v1029_v61 }
  0xa4   :  { %v117_v18 = vmul.f32 0.00390625, %v75_v34  ;;  %v253_v34 = vrot.slane %v123_v37, %v1036_v11 }
  0xa6   :  { %v102_v35 = vpop.xlane.xlu1 %101  ;;  %v212_v6 = vrot.slane %v117_v18, %v1042_v23 }
  0xa7   :  { %v78_v40 = vpop.xlane.xlu0 %77  ;;  %v126_v63 = vmul.f32 0.00390625, %v102_v35  ;;  %v262_v35 = vrot.slane %v125_v36, %v1042_v23 }
  0xa8   :  { %v118_v28 = vmul.f32 0.00390625, %v78_v40  ;;  %v200_v40 = vrot.slane %v115_v19, %v1036_v11 }
  0xa9   :  { %v267_v57 = vrot.slane %v126_v63, %v1045_v45 }
  0xaa   :  { %v1017_v41 = vpop.xlane.xlu1 %135  ;;  %v219_v37 = vrot.slane %v118_v28, %v1045_v45  ;;  %v207_v18 = vsel %vm206_vm1, %v205_v25, %v200_v40 }
  0xab   :  { %v1019_v42 = vpop.xlane.xlu0 %132  ;;  %v315_v36 = vrot.slane %v1017_v41, %v1039_v17 }
  0xac   :  { %v311_v44 = vrot.slane %v1019_v42, %v1036_v11  ;;  %v214_v42 = vsel %vm213_vm2, %v212_v6, %v207_v18 }
  0xae   :  { %v1021_v43 = vpop.xlane.xlu1 %159 }
  0xaf   :  { %v1023_v48 = vpop.xlane.xlu0 %156 }
  0xb0   :  { %v350_v63 = vrot.slane %v1023_v48, %v1036_v11  ;;  %v316_v48 = vsel %vm206_vm1, %v315_v36, %v311_v44 }
  0xb2   :  { %v105_v49 = vpop.xlane.xlu1 %104 }
  0xb3   :  { %v81_v50 = vpop.xlane.xlu0 %80  ;;  %v127_v10 = vmul.f32 0.00390625, %v105_v49  ;;  %v258_v49 = vsel %vm206_vm1, %v257_v3, %v253_v34 }
  0xb4   :  { %v119_v60 = vmul.f32 0.00390625, %v81_v50  ;;  %v354_v50 = vrot.slane %v1021_v43, %v1039_v17  ;;  %v263_v28 = vsel %vm213_vm2, %v262_v35, %v258_v49  ;;  %v221_v43 = vsel %vm220_vm3, %v219_v37, %v214_v42 }
  0xb5   :  { %v272_v27 = vrot.slane %v127_v10, %v1054_v33  ;;  %v268_v5 = vsel %vm220_vm3, %v267_v57, %v263_v28 }
  0xb6   :  { %v1025_v51 = vpop.xlane.xlu1 %162  ;;  %v226_v41 = vrot.slane %v119_v60, %v1054_v33  ;;  %v355_v35 = vsel %vm206_vm1, %v354_v50, %v350_v63 }
  0xb7   :  { %v1027_v56 = vpop.xlane.xlu0 %138  ;;  %v359_v11 = vrot.slane %v1025_v51, %v1042_v23 }
  0xb8   :  { %v320_v6 = vrot.slane %v1027_v56, %v1042_v23 }
  0xb9   :  { %v360_v49 = vsel %vm213_vm2, %v359_v11, %v355_v35 }
  0xba   :  { %v108_v58 = vpop.xlane.xlu1 %107 }
  0xbb   :  { %v84_v59 = vpop.xlane.xlu0 %83  ;;  %v128_v3 = vmul.f32 0.00390625, %v108_v58  ;;  %v273_v58 = vsel %vm227_vm4, %v272_v27, %v268_v5 }
  0xbc   :  { %v120_v34 = vmul.f32 0.00390625, %v84_v59 }
  0xbe   :  { %v1031_v62 = vpop.xlane.xlu1 %165  ;;  %v233_v60 = vrot.slane %v120_v34, %v1057_v26 }
  0xbf   :  { %v1033_v7 = vpop.xlane.xlu0 %141  ;;  %v364_v51 = vrot.slane %v1031_v62, %v1045_v45 }
  0xc0   :  { %v325_v57 = vrot.slane %v1033_v7, %v1045_v45  ;;  %v321_v45 = vsel %vm213_vm2, %v320_v6, %v316_v48 }
  0xc1   :  { %v365_v63 = vsel %vm220_vm3, %v364_v51, %v360_v49 }
  0xc2   :  { %v111_v16 = vpop.xlane.xlu1 %110 }
  0xc3   :  { %v87_v24 = vpop.xlane.xlu0 %86  ;;  %v129_v25 = vmul.f32 0.00390625, %v111_v16  ;;  %v228_v16 = vsel %vm227_vm4, %v226_v41, %v221_v43 }
  0xc4   :  { %v121_v40 = vmul.f32 0.00390625, %v87_v24  ;;  %v277_v24 = vrot.slane %v128_v3, %v1057_v26  ;;  %v235_v50 = vsel %vm234_vm5, %v233_v60, %v228_v16 }
  0xc5   :  { %v282_v5 = vrot.slane %v129_v25, %v1062_v22 }
  0xc6   :  { %v1047_v29 = vpop.xlane.xlu1 %168 }
  0xc7   :  { %v1050_v32 = vpop.xlane.xlu0 %144  ;;  %v369_v56 = vrot.slane %v1047_v29, %v1054_v33  ;;  %v278_v29 = vsel %vm234_vm5, %v277_v24, %v273_v58 }
  0xc8   :  { %v330_v37 = vrot.slane %v1050_v32, %v1054_v33  ;;  %v326_v33 = vsel %vm220_vm3, %v325_v57, %v321_v45  ;;  %v730_v57 = vld [vmem:[%s1188_s4] ss:$0 sm:$0xff] }
  0xc9   :  { %v370_v28 = vsel %vm227_vm4, %v369_v56, %v365_v63 }
  0xca   :  { %v114_v52 = vpop.xlane.xlu1 %113 }
  0xcb   :  { %v90_v19 = vpop.xlane.xlu0 %89  ;;  %v130_v17 = vmul.f32 0.00390625, %v114_v52  ;;  %v240_v52 = vrot.slane %v121_v40, %v1062_v22 }
  0xcc   :  { %v122_v59 = vmul.f32 0.00390625, %v90_v19 }
  0xcd   :  { %v287_v36 = vrot.slane %v130_v17, %v1068_v53  ;;  %v242_v27 = vsel %vm241_vm6, %v240_v52, %v235_v50 }
  0xce   :  { %v172_v13 = vpop.xlane.xlu1 %171  ;;  %v247_v7 = vrot.slane %v122_v59, %v1068_v53  ;;  %v481_v59 = vld [vmem:[%s1187_s3] sm:$0xf] }
  0xcf   :  { %v148_v10 = vpop.xlane.xlu0 %147  ;;  %v374_v62 = vrot.slane %v172_v13, %v1057_v26  ;;  %v283_v13 = vsel %vm241_vm6, %v282_v5, %v278_v29  ;;  %765 = vmatpush3.msk.msra.mxu1 %vm493_vm12, %v481_v59 }
  0xd0   :  { %v335_v19 = vrot.slane %v148_v10, %v1057_v26  ;;  %v331_v26 = vsel %vm227_vm4, %v330_v37, %v326_v33  ;;  %v288_v3 = vsel %vm248_vm7, %v287_v36, %v283_v13 }
  0xd1   :  { %v375_v34 = vsel %vm234_vm5, %v374_v62, %v370_v28 }
  0xd2   :  { %v175_v23 = vpop.xlane.xlu1 %174  ;;  %v336_v40 = vsel %vm234_vm5, %v335_v19, %v331_v26  ;;  %v614_v19 = vsub.s32 1, %v1029_v61 }
  0xd3   :  { %v151_v44 = vpop.xlane.xlu0 %150  ;;  %v379_v18 = vrot.slane %v175_v23, %v1062_v22 }
  0xd4   :  { %v340_v32 = vrot.slane %v151_v44, %v1062_v22  ;;  %v249_v22 = vsel %vm248_vm7, %v247_v7, %v242_v27  ;;  %v579_v44 = vsub.s32 0, %v1029_v61 }
  0xd5   :  { %v380_v43 = vsel %vm241_vm6, %v379_v18, %v375_v34  ;;  %v290_v35 = vsel %vm289_vm8, %v288_v3, %v249_v22 }
  0xd6   :  { %v178_v41 = vpop.xlane.xlu1 %177  ;;  %v341_v11 = vsel %vm241_vm6, %v340_v32, %v336_v40 }
  0xd7   :  { %v384_v42 = vrot.slane %v178_v41, %v1068_v53  ;;  %v154_v25 = vpop.xlane.xlu0 %153 }
  0xd8   :  { %v345_v48 = vrot.slane %v154_v25, %v1068_v53  ;;  %v728_v53 = vld [vmem:[%s1186_s2] ss:$0 sm:$0xff]  ;;  %s828_s2 = smov [#allocation5]  }
  0xd9   :  { %v385_v17 = vsel %vm248_vm7, %v384_v42, %v380_v43  ;;  %v1216_v43 = vld [vmem:[#allocation10_spill] sm:$0xff]  ;;  %s716_s3 = sshll.u32 %s828_s2, 4  ;;  %s717_s3 = int_to_ptr.vmem [resolvable:$true] %s716_s3 }
  0xda   :  { %v346_v10 = vsel %vm248_vm7, %v345_v48, %v341_v11  ;;  %v1218_v11 = vld [vmem:[#allocation9_spill] sm:$0xff]  ;;  %s799_s4 = scalar_lea.vmem %s717_s3, 4096  ;;  %p804_p6 = scmp.lt.s32.totalorder %s717_s3, %s717_s3 }
  0xdb   :  { %v387_v58 = vsel %vm386_vm9, %v385_v17, %v346_v10  ;;  %v1219_v10 = vld [vmem:[#allocation13_spill] sm:$0xff]  ;;  %p800_p5 = scmp.ne.s32.totalorder %s717_s3, %s799_s4  ;;  %p805_p7 = scmp.lt.s32.totalorder %s799_s4, %s799_s4 }
  0xdc   :  { %v390_v6 = vsel %vm389_vm10, %v290_v35, %v387_v58  ;;  %v1220_v58 = vld [vmem:[#allocation14_spill] sm:$0xff] }
  0xdd   :  { %762 = vmatmul.mubr.msk.f32.vlgmr.msra.gmra.mxu0 %vm406_vm11, %v390_v6  ;;  %v1221_v6 = vld [vmem:[#allocation11_spill] sm:$0xff]  ;;  %p806_p8 = por %p805_p7, %p804_p6 }
  0xdf   :  { %p807_p9 = pnand %p806_p8, %p800_p5 }
 0x19d   :  { %v476_v16 = vpop.f32.mrf.mxu0 }
 0x19e   :  { %v477_v24 = vadd.f32 %v728_v53, %v476_v16  ;;  %v1222_v53 = vld [vmem:[#allocation12_spill] sm:$0xff] }
 0x19f   :  { %v763_v60 = vpop.f32.mrf.mxu0 }
 0x1a0   :  { %v480_v51 = vmax.f32 %v477_v24, 0.0  ;;  %v1223_v24 = vld [vmem:[#allocation17_spill] sm:$0xff] }
 0x1a2   :  { %767 = vmatmul.mubr.msk.f32.vlgmr.msra.gmra.mxu1 %vm489_vm13, %v480_v51  ;;  %v1224_v51 = vld [vmem:[#allocation18_spill] sm:$0xff] }
 0x262   :  { %v563_v5 = vpop.f32.mrf.mxu1 }
 0x263   :  { %v564_v52 = vadd.f32 %v730_v57, %v563_v5 }
 0x264   :  { %v768_v56 = vpop.f32.mrf.mxu1 }
 0x265   :  { %v568_v23 = vrot.slane %v564_v52, 2 }
 0x267   :  { %v570_v49 = vadd.f32 %v568_v23, %v564_v52  ;;  %v1225_v52 = vld [vmem:[#allocation15_spill] sm:$0xff]  ;;  %v1226_v23 = vld [vmem:[#allocation16_spill] sm:$0xff] }
 0x269   :  { %v733_v37 = vmul.f32 -1.442695, %v570_v49 }
 0x26b   :  { %775 = vpow2.f32 %v733_v37 }
 0x278   :  { %v776_v36 = vpop.eup %775 }
 0x279   :  { %v574_v62 = vadd.f32 1.0, %v776_v36  ;;  %v1227_v36 = vld [vmem:[#allocation19_spill] sm:$0xff] }
 0x27b   :  { %777 = vrcp.f32 %v574_v62 }
 0x288   :  { %v778_v45 = vpop.eup %777 }
 0x289   :  { %v580_v7 = vrot.slane %v778_v45, %v579_v44  ;;  %v615_v18 = vrot.slane %v778_v45, %v614_v19  ;;  %v1228_v44 = vld [vmem:[#allocation20_spill] sm:$0xff] }
 0x28b   :  { %586 = vbcast.lane.b32.xlu1 %v580_v7, 264  ;;  %582 = vbcast.lane.b32.xlu0 %v580_v7, 256 }
 0x28f   :  { %590 = vbcast.lane.b32.xlu1 %v580_v7, 272  ;;  %598 = vbcast.lane.b32.xlu0 %v580_v7, 288 }
 0x293   :  { %594 = vbcast.lane.b32.xlu1 %v580_v7, 280  ;;  %606 = vbcast.lane.b32.xlu0 %v580_v7, 304 }
 0x297   :  { %602 = vbcast.lane.b32.xlu1 %v580_v7, 296  ;;  %617 = vbcast.lane.b32.xlu0 %v615_v18, 256 }
 0x29b   :  { %610 = vbcast.lane.b32.xlu1 %v580_v7, 312  ;;  %625 = vbcast.lane.b32.xlu0 %v615_v18, 272 }
 0x29f   :  { %621 = vbcast.lane.b32.xlu1 %v615_v18, 264  ;;  %633 = vbcast.lane.b32.xlu0 %v615_v18, 288 }
 0x2a3   :  { %629 = vbcast.lane.b32.xlu1 %v615_v18, 280  ;;  %641 = vbcast.lane.b32.xlu0 %v615_v18, 304 }
 0x2a7   :  { %637 = vbcast.lane.b32.xlu1 %v615_v18, 296 }
 0x2ab   :  { %645 = vbcast.lane.b32.xlu1 %v615_v18, 312 }
 0x2fd   :  { %v587_v29 = vpop.permute.xlu1 %586  ;;  %v583_v50 = vpop.permute.xlu0 %582 }
 0x2fe   :  { %v649_v63 = vmul.f32 %v587_v29, %v881_v8  ;;  %v650_v32 = vmul.f32 %v587_v29, %v883_v9  ;;  %v647_v61 = vmul.f32 %v583_v50, %v869_v2  ;;  %v648_v33 = vmul.f32 %v583_v50, %v873_v4 }
 0x300   :  { %681 = vst [vmem:[#allocation5 + $0x10] sm:$0xff] %v649_v63  ;;  %682 = vst [vmem:[#allocation5 + $0x18] sm:$0xff] %v650_v32 }
 0x301   :  { %679 = vst [vmem:[#allocation5] sm:$0xff] %v647_v61  ;;  %680 = vst [vmem:[#allocation5 + $0x8] sm:$0xff] %v648_v33  ;;  %v591_v13 = vpop.permute.xlu1 %590  ;;  %v599_v27 = vpop.permute.xlu0 %598 }
 0x302   :  { %v651_v28 = vmul.f32 %v591_v13, %v893_v14  ;;  %v652_v41 = vmul.f32 %v591_v13, %v895_v15  ;;  %v655_v26 = vmul.f32 %v599_v27, %v925_v30  ;;  %v656_v8 = vmul.f32 %v599_v27, %v927_v31 }
 0x304   :  { %683 = vst [vmem:[#allocation5 + $0x20] sm:$0xff] %v651_v28  ;;  %684 = vst [vmem:[#allocation5 + $0x28] sm:$0xff] %v652_v41 }
 0x305   :  { %687 = vst [vmem:[#allocation5 + $0x40] sm:$0xff] %v655_v26  ;;  %688 = vst [vmem:[#allocation5 + $0x48] sm:$0xff] %v656_v8  ;;  %v595_v2 = vpop.permute.xlu1 %594  ;;  %v607_v4 = vpop.permute.xlu0 %606 }
 0x306   :  { %v653_v9 = vmul.f32 %v595_v2, %v905_v20  ;;  %v654_v3 = vmul.f32 %v595_v2, %v907_v21  ;;  %v659_v34 = vmul.f32 %v607_v4, %v957_v46  ;;  %v660_v14 = vmul.f32 %v607_v4, %v959_v47 }
 0x308   :  { %685 = vst [vmem:[#allocation5 + $0x30] sm:$0xff] %v653_v9  ;;  %686 = vst [vmem:[#allocation5 + $0x38] sm:$0xff] %v654_v3 }
 0x309   :  { %691 = vst [vmem:[#allocation5 + $0x60] sm:$0xff] %v659_v34  ;;  %692 = vst [vmem:[#allocation5 + $0x68] sm:$0xff] %v660_v14  ;;  %v603_v15 = vpop.permute.xlu1 %602  ;;  %v618_v30 = vpop.permute.xlu0 %617 }
 0x30a   :  { %v657_v31 = vmul.f32 %v603_v15, %v941_v38  ;;  %v658_v42 = vmul.f32 %v603_v15, %v943_v39  ;;  %v663_v25 = vmul.f32 %v618_v30, %v865_v0  ;;  %v664_v20 = vmul.f32 %v618_v30, %v867_v1  ;;  %v1217_v39 = vld [vmem:[#allocation8_spill] sm:$0xff] }
 0x30c   :  { %689 = vst [vmem:[#allocation5 + $0x50] sm:$0xff] %v657_v31  ;;  %690 = vst [vmem:[#allocation5 + $0x58] sm:$0xff] %v658_v42 }
 0x30d   :  { %695 = vst [vmem:[#allocation5 + $0x80] sm:$0xff] %v663_v25  ;;  %696 = vst [vmem:[#allocation5 + $0x88] sm:$0xff] %v664_v20  ;;  %v611_v21 = vpop.permute.xlu1 %610  ;;  %v626_v46 = vpop.permute.xlu0 %625 }
 0x30e   :  { %v661_v47 = vmul.f32 %v611_v21, %v973_v54  ;;  %v662_v22 = vmul.f32 %v611_v21, %v975_v55  ;;  %v667_v40 = vmul.f32 %v626_v46, %v889_v12  ;;  %v668_v38 = vmul.f32 %v626_v46, %v1216_v43 }
 0x310   :  { %693 = vst [vmem:[#allocation5 + $0x70] sm:$0xff] %v661_v47  ;;  %694 = vst [vmem:[#allocation5 + $0x78] sm:$0xff] %v662_v22 }
 0x311   :  { %699 = vst [vmem:[#allocation5 + $0xa0] sm:$0xff] %v667_v40  ;;  %700 = vst [vmem:[#allocation5 + $0xa8] sm:$0xff] %v668_v38  ;;  %v622_v0 = vpop.permute.xlu1 %621  ;;  %v634_v1 = vpop.permute.xlu0 %633 }
 0x312   :  { %v665_v48 = vmul.f32 %v622_v0, %v1217_v39  ;;  %v666_v17 = vmul.f32 %v622_v0, %v1218_v11  ;;  %v671_v35 = vmul.f32 %v634_v1, %v1219_v10  ;;  %v672_v54 = vmul.f32 %v634_v1, %v1220_v58 }
 0x314   :  { %697 = vst [vmem:[#allocation5 + $0x90] sm:$0xff] %v665_v48  ;;  %698 = vst [vmem:[#allocation5 + $0x98] sm:$0xff] %v666_v17 }
 0x315   :  { %703 = vst [vmem:[#allocation5 + $0xc0] sm:$0xff] %v671_v35  ;;  %704 = vst [vmem:[#allocation5 + $0xc8] sm:$0xff] %v672_v54  ;;  %v630_v12 = vpop.permute.xlu1 %629  ;;  %v642_v55 = vpop.permute.xlu0 %641 }
 0x316   :  { %v669_v59 = vmul.f32 %v630_v12, %v1221_v6  ;;  %v670_v16 = vmul.f32 %v630_v12, %v1222_v53  ;;  %v675_v60 = vmul.f32 %v642_v55, %v1223_v24  ;;  %v676_v57 = vmul.f32 %v642_v55, %v1224_v51 }
 0x318   :  { %701 = vst [vmem:[#allocation5 + $0xb0] sm:$0xff] %v669_v59  ;;  %702 = vst [vmem:[#allocation5 + $0xb8] sm:$0xff] %v670_v16 }
 0x319   :  { %707 = vst [vmem:[#allocation5 + $0xe0] sm:$0xff] %v675_v60  ;;  %708 = vst [vmem:[#allocation5 + $0xe8] sm:$0xff] %v676_v57  ;;  %v638_v5 = vpop.permute.xlu1 %637 }
 0x31a   :  { %v673_v56 = vmul.f32 %v638_v5, %v1225_v52  ;;  %v674_v49 = vmul.f32 %v638_v5, %v1226_v23 }
 0x31c   :  { %705 = vst [vmem:[#allocation5 + $0xd0] sm:$0xff] %v673_v56  ;;  %706 = vst [vmem:[#allocation5 + $0xd8] sm:$0xff] %v674_v49 }
 0x31d   :  { %v646_v37 = vpop.permute.xlu1 %645 }
 0x31e   :  { %v677_v62 = vmul.f32 %v646_v37, %v1227_v36  ;;  %v678_v45 = vmul.f32 %v646_v37, %v1228_v44 }
 0x320   :  { %709 = vst [vmem:[#allocation5 + $0xf0] sm:$0xff] %v677_v62  ;;  %710 = vst [vmem:[#allocation5 + $0xf8] sm:$0xff] %v678_v45 }
 0x321   :  { %810 = shalt.err (!%p807_p9)
}
 0x322   :  { %722 = dma.vmem_to_hbm [thread:$0]  %s717_s3, 4096, %s1189_s5, [#allocation4], %s824_s21, %s824_s21, %s825_s22  }
 0x323   :  { %821 = dma.done.wait [#allocation4], 4096  }
 0x324   :  { %822 = vsyncadd [#allocation4], 4294963200 }
 0x325   :  { %726 = vsyncpa [#allocation3], 1 }
 0x326   :  { %727 = vsyncpa [#allocation4], 1 }

</bundles_post_ra>
